<compile_context>
chip_gen: v5e
topology: v5e:2x2
jax: 0.10.0
libtpu: 0.0.40
codegen_flags: <defaults>
</compile_context>

<pallas_src>
import functools

import jax
import jax.numpy as jnp
from jax.experimental import pallas as pl
from jax.experimental.pallas import tpu as pltpu


def dqn_kernel(x_ref, m_ref, w1_ref, b1_ref, w2_ref, b2_ref, w3_ref, b3_ref,
               o_ref):
    # fc1 + ReLU  (cast x to bf16 for the MXU, f32 accumulate, f32 elementwise)
    x = x_ref[...].astype(w1_ref.dtype)
    h1 = jnp.dot(x, w1_ref[...], preferred_element_type=jnp.float32)
    h1 = jnp.maximum(h1 + b1_ref[...], 0.0)
    # fc2 + ReLU
    h2 = jnp.dot(h1.astype(w2_ref.dtype), w2_ref[...],
                 preferred_element_type=jnp.float32)
    h2 = jnp.maximum(h2 + b2_ref[...], 0.0)
    # fc3 (narrow q-values) + additive action-mask penalty.
    # where(m, q, q - 2**16) == q + (m - 1) * 2**16 for m in {0, 1}.
    q = jnp.dot(h2.astype(w3_ref.dtype), w3_ref[...],
                preferred_element_type=jnp.float32)
    o_ref[...] = q + b3_ref[...] + (m_ref[...] - 1.0) * 65536.0


def prepare_params(params, compute_dtype=jnp.bfloat16):
    """One-time prep: cast weights to bf16 for the MXU, biases stay f32."""
    w1, b1, w2, b2, w3, b3 = params
    return (w1.astype(compute_dtype), b1.astype(jnp.float32),
            w2.astype(compute_dtype), b2.astype(jnp.float32),
            w3.astype(compute_dtype), b3.astype(jnp.float32))


@functools.partial(jax.jit, static_argnames=("tb",))
def dqn_forward(x, action_mask, prepared, tb=1024):
    w1, b1, w2, b2, w3, b3 = prepared
    B, input_dim = x.shape
    out_dim = w3.shape[1]

    # Batch tile: multiple of 16 (bf16 sublane packing), capped at the batch.
    B16 = -(-B // 16) * 16
    tb = max(16, min((tb // 16) * 16, B16))
    # Ensure >= 2 grid steps when the batch allows, so the "parallel" batch
    # axis can give both TensorCores work on v7x (no-op on v5e / v6e).
    if B16 >= 32 and tb >= B16:
        tb = max(16, ((B16 // 2) // 16) * 16)
    Bp = -(-B // tb) * tb
    n_tiles = Bp // tb

    xb = x  # stays f32; cast to bf16 happens inside the kernel
    mask_f = action_mask.astype(jnp.float32)
    if Bp != B:
        xb = jnp.pad(xb, ((0, Bp - B), (0, 0)))
        mask_f = jnp.pad(mask_f, ((0, Bp - B), (0, 0)))

    def full(a):
        # Resident block: DMA'd once, stays in VMEM across all grid steps.
        return pl.BlockSpec(a.shape, lambda i: (0,) * a.ndim)

    out = pl.pallas_call(
        dqn_kernel,
        out_shape=jax.ShapeDtypeStruct((Bp, out_dim), jnp.float32),
        grid=(n_tiles,),
        in_specs=[
            pl.BlockSpec((tb, input_dim), lambda i: (i, 0)),   # x tile (f32)
            pl.BlockSpec((tb, out_dim), lambda i: (i, 0)),     # mask tile (f32)
            full(w1), full(b1),                                # resident weights
            full(w2), full(b2),
            full(w3), full(b3),
        ],
        out_specs=pl.BlockSpec((tb, out_dim), lambda i: (i, 0)),
        compiler_params=pltpu.CompilerParams(
            dimension_semantics=("parallel",)),
    )(xb, mask_f, w1, b1, w2, b2, w3, b3)

    return out[:B] if Bp != B else out


def init_params(key, input_dim, hidden, output_dim):
    ks = jax.random.split(key, 6)

    # Deterministic synthetic init (uniform, roughly like PyTorch's default).
    def lin(kw, kb, fan_in, fan_out):
        bound = 1.0 / jnp.sqrt(fan_in)
        w = jax.random.uniform(kw, (fan_in, fan_out), jnp.float32, -bound, bound)
        b = jax.random.uniform(kb, (1, fan_out), jnp.float32, -bound, bound)
        return w, b

    w1, b1 = lin(ks[0], ks[1], input_dim, hidden)
    w2, b2 = lin(ks[2], ks[3], hidden, hidden)
    w3, b3 = lin(ks[4], ks[5], hidden, output_dim)
    return (w1, b1, w2, b2, w3, b3)


if __name__ == "__main__":
    key = jax.random.PRNGKey(0)
    k_x, k_m, k_p = jax.random.split(key, 3)

    batch = 8
    input_dim = 32
    hidden = 128
    output_dim = 8

    x = jax.random.normal(k_x, (batch, input_dim), jnp.float32)
    action_mask = jax.random.bernoulli(k_m, 0.7, (batch, output_dim))
    params = init_params(k_p, input_dim, hidden, output_dim)

    prepared = prepare_params(params)
    q = dqn_forward(x, action_mask, prepared)
    jax.block_until_ready(q)

    # Pure-JAX reference with identical bf16-weight / f32-accumulate math.
    # (Weights are bf16 for the MXU; PyTorch reference is f32 throughout, so
    #  a ~1e-3-level per-matmul deviation is expected and accepted here.)
    w1, b1, w2, b2, w3, b3 = params
    cd = jnp.bfloat16
    h1 = jnp.maximum(jnp.dot(x.astype(cd), w1.astype(cd),
                             preferred_element_type=jnp.float32) + b1, 0.0)
    h2 = jnp.maximum(jnp.dot(h1.astype(cd), w2.astype(cd),
                             preferred_element_type=jnp.float32) + b2, 0.0)
    q_ref = jnp.dot(h2.astype(cd), w3.astype(cd),
                    preferred_element_type=jnp.float32) + b3
    q_ref = jnp.where(action_mask, q_ref, q_ref - 65536.0)

    assert q.shape == q_ref.shape, (q.shape, q_ref.shape)
    assert jnp.allclose(q, q_ref, atol=1e-2, rtol=1e-2), \
        float(jnp.max(jnp.abs(q - q_ref)))

    print("KERNEL_OK")
</pallas_src>

<mosaic_0001>
module attributes {stable_mosaic.version = 11 : i64} {
  func.func @dqn_kernel(%arg0: i32, %arg1: memref<16x32xf32, #tpu.memory_space<vmem>>, %arg2: memref<16x8xf32, #tpu.memory_space<vmem>>, %arg3: memref<32x128xbf16, #tpu.memory_space<vmem>>, %arg4: memref<1x128xf32, #tpu.memory_space<vmem>>, %arg5: memref<128x128xbf16, #tpu.memory_space<vmem>>, %arg6: memref<1x128xf32, #tpu.memory_space<vmem>>, %arg7: memref<128x8xbf16, #tpu.memory_space<vmem>>, %arg8: memref<1x8xf32, #tpu.memory_space<vmem>>, %arg9: memref<16x8xf32, #tpu.memory_space<vmem>>) attributes {dimension_semantics = [#tpu.dimension_semantics<parallel>], iteration_bounds = array<i64: 1>, scalar_prefetch = 0 : i64, scratch_operands = 0 : i64, tpu.core_type = #tpu.core_type<tc>, window_params = [{transform_indices = @transform_0, window_bounds = array<i64: 16, 32>}, {transform_indices = @transform_1, window_bounds = array<i64: 16, 8>}, {pipeline_mode = #tpu.pipeline_mode<synchronous>, transform_indices = @transform_2, window_bounds = array<i64: 32, 128>}, {pipeline_mode = #tpu.pipeline_mode<synchronous>, transform_indices = @transform_3, window_bounds = array<i64: 1, 128>}, {pipeline_mode = #tpu.pipeline_mode<synchronous>, transform_indices = @transform_4, window_bounds = array<i64: 128, 128>}, {pipeline_mode = #tpu.pipeline_mode<synchronous>, transform_indices = @transform_5, window_bounds = array<i64: 1, 128>}, {pipeline_mode = #tpu.pipeline_mode<synchronous>, transform_indices = @transform_6, window_bounds = array<i64: 128, 8>}, {pipeline_mode = #tpu.pipeline_mode<synchronous>, transform_indices = @transform_7, window_bounds = array<i64: 1, 8>}, {transform_indices = @transform_8, window_bounds = array<i64: 16, 8>}]} {
    %c0 = arith.constant 0 : index
    %c0_0 = arith.constant 0 : index
    %0 = vector.load %arg1[%c0, %c0_0] : memref<16x32xf32, #tpu.memory_space<vmem>>, vector<16x32xf32>
    %1 = arith.truncf %0 : vector<16x32xf32> to vector<16x32xbf16>
    %c0_1 = arith.constant 0 : index
    %c0_2 = arith.constant 0 : index
    %2 = vector.load %arg3[%c0_1, %c0_2] : memref<32x128xbf16, #tpu.memory_space<vmem>>, vector<32x128xbf16>
    %cst = arith.constant dense<0.000000e+00> : vector<16x128xf32>
    %3 = tpu.matmul %1, %2, %cst {dimension_numbers = #tpu.dot_dimension_numbers<[1], [0], [0], [1], [0, 0, 1, 1], [], []>} : vector<16x32xbf16>, vector<32x128xbf16>, vector<16x128xf32> -> vector<16x128xf32>
    %c0_3 = arith.constant 0 : index
    %c0_4 = arith.constant 0 : index
    %4 = vector.load %arg4[%c0_3, %c0_4] : memref<1x128xf32, #tpu.memory_space<vmem>>, vector<1x128xf32>
    %5 = vector.broadcast %4 : vector<1x128xf32> to vector<16x128xf32>
    %6 = arith.addf %3, %5 : vector<16x128xf32>
    %cst_5 = arith.constant 0.000000e+00 : f32
    %7 = vector.broadcast %cst_5 : f32 to vector<16x128xf32>
    %8 = arith.maximumf %6, %7 : vector<16x128xf32>
    %9 = arith.truncf %8 : vector<16x128xf32> to vector<16x128xbf16>
    %c0_6 = arith.constant 0 : index
    %c0_7 = arith.constant 0 : index
    %10 = vector.load %arg5[%c0_6, %c0_7] : memref<128x128xbf16, #tpu.memory_space<vmem>>, vector<128x128xbf16>
    %cst_8 = arith.constant dense<0.000000e+00> : vector<16x128xf32>
    %11 = tpu.matmul %9, %10, %cst_8 {dimension_numbers = #tpu.dot_dimension_numbers<[1], [0], [0], [1], [0, 0, 1, 1], [], []>} : vector<16x128xbf16>, vector<128x128xbf16>, vector<16x128xf32> -> vector<16x128xf32>
    %c0_9 = arith.constant 0 : index
    %c0_10 = arith.constant 0 : index
    %12 = vector.load %arg6[%c0_9, %c0_10] : memref<1x128xf32, #tpu.memory_space<vmem>>, vector<1x128xf32>
    %13 = vector.broadcast %12 : vector<1x128xf32> to vector<16x128xf32>
    %14 = arith.addf %11, %13 : vector<16x128xf32>
    %cst_11 = arith.constant 0.000000e+00 : f32
    %15 = vector.broadcast %cst_11 : f32 to vector<16x128xf32>
    %16 = arith.maximumf %14, %15 : vector<16x128xf32>
    %17 = arith.truncf %16 : vector<16x128xf32> to vector<16x128xbf16>
    %c0_12 = arith.constant 0 : index
    %c0_13 = arith.constant 0 : index
    %18 = vector.load %arg7[%c0_12, %c0_13] : memref<128x8xbf16, #tpu.memory_space<vmem>>, vector<128x8xbf16>
    %cst_14 = arith.constant dense<0.000000e+00> : vector<16x8xf32>
    %19 = tpu.matmul %17, %18, %cst_14 {dimension_numbers = #tpu.dot_dimension_numbers<[1], [0], [0], [1], [0, 0, 1, 1], [], []>} : vector<16x128xbf16>, vector<128x8xbf16>, vector<16x8xf32> -> vector<16x8xf32>
    %c0_15 = arith.constant 0 : index
    %c0_16 = arith.constant 0 : index
    %20 = vector.load %arg8[%c0_15, %c0_16] : memref<1x8xf32, #tpu.memory_space<vmem>>, vector<1x8xf32>
    %21 = vector.broadcast %20 : vector<1x8xf32> to vector<16x8xf32>
    %22 = arith.addf %19, %21 : vector<16x8xf32>
    %c0_17 = arith.constant 0 : index
    %c0_18 = arith.constant 0 : index
    %23 = vector.load %arg2[%c0_17, %c0_18] : memref<16x8xf32, #tpu.memory_space<vmem>>, vector<16x8xf32>
    %cst_19 = arith.constant 1.000000e+00 : f32
    %24 = vector.broadcast %cst_19 : f32 to vector<16x8xf32>
    %25 = arith.subf %23, %24 : vector<16x8xf32>
    %cst_20 = arith.constant 6.553600e+04 : f32
    %26 = vector.broadcast %cst_20 : f32 to vector<16x8xf32>
    %27 = arith.mulf %25, %26 : vector<16x8xf32>
    %28 = arith.addf %22, %27 : vector<16x8xf32>
    %c0_21 = arith.constant 0 : index
    %c0_22 = arith.constant 0 : index
    %29 = vector.load %arg9[%c0_21, %c0_22] : memref<16x8xf32, #tpu.memory_space<vmem>>, vector<16x8xf32>
    tpu.vector_store %arg9[%c0_21, %c0_22], %28 {strides = array<i32>} : memref<16x8xf32, #tpu.memory_space<vmem>>, vector<16x8xf32>,
    return
  }
  func.func @transform_0(%arg0: i32) -> (i32, i32) {
    %c0_i32 = arith.constant 0 : i32
    %c0_i32_0 = arith.constant 0 : i32
    return %arg0, %c0_i32 : i32, i32
  }
  func.func @transform_1(%arg0: i32) -> (i32, i32) {
    %c0_i32 = arith.constant 0 : i32
    %c0_i32_0 = arith.constant 0 : i32
    return %arg0, %c0_i32 : i32, i32
  }
  func.func @transform_2(%arg0: i32) -> (i32, i32) {
    %c0_i32 = arith.constant 0 : i32
    %c0_i32_0 = arith.constant 0 : i32
    %c0_i32_1 = arith.constant 0 : i32
    return %c0_i32, %c0_i32_0 : i32, i32
  }
  func.func @transform_3(%arg0: i32) -> (i32, i32) {
    %c0_i32 = arith.constant 0 : i32
    %c0_i32_0 = arith.constant 0 : i32
    %c0_i32_1 = arith.constant 0 : i32
    return %c0_i32, %c0_i32_0 : i32, i32
  }
  func.func @transform_4(%arg0: i32) -> (i32, i32) {
    %c0_i32 = arith.constant 0 : i32
    %c0_i32_0 = arith.constant 0 : i32
    %c0_i32_1 = arith.constant 0 : i32
    return %c0_i32, %c0_i32_0 : i32, i32
  }
  func.func @transform_5(%arg0: i32) -> (i32, i32) {
    %c0_i32 = arith.constant 0 : i32
    %c0_i32_0 = arith.constant 0 : i32
    %c0_i32_1 = arith.constant 0 : i32
    return %c0_i32, %c0_i32_0 : i32, i32
  }
  func.func @transform_6(%arg0: i32) -> (i32, i32) {
    %c0_i32 = arith.constant 0 : i32
    %c0_i32_0 = arith.constant 0 : i32
    %c0_i32_1 = arith.constant 0 : i32
    return %c0_i32, %c0_i32_0 : i32, i32
  }
  func.func @transform_7(%arg0: i32) -> (i32, i32) {
    %c0_i32 = arith.constant 0 : i32
    %c0_i32_0 = arith.constant 0 : i32
    %c0_i32_1 = arith.constant 0 : i32
    return %c0_i32, %c0_i32_0 : i32, i32
  }
  func.func @transform_8(%arg0: i32) -> (i32, i32) {
    %c0_i32 = arith.constant 0 : i32
    %c0_i32_0 = arith.constant 0 : i32
    return %arg0, %c0_i32 : i32, i32
  }
}

</mosaic_0001>

<bundles_post_ra>
// kernel: dqn_forward.1
= control target key start
LH: loop header
LB: loop body
LE: loop exit
PB: predicated region body
PF: predicated region fallthrough
CT: control target
= control target key end

     0   :  { %vm53_vm0 = vcmask 261120   ;;  %vm249_vm1 = vcmask 64512   ;;  %s478_s2 = inlined_call_operand.vmem [shape: bf16[32,128], index: 2, kind: input, shape index: {}]   ;;  %s479_s0 = inlined_call_operand.vmem [shape: f32[16,32], index: 0, kind: input, shape index: {}]   ;;  %s480_s4 = inlined_call_operand.vmem [shape: bf16[128,128], index: 4, kind: input, shape index: {}]   ;;  %s481_s3 = inlined_call_operand.vmem [shape: f32[1,128], index: 3, kind: input, shape index: {}]   ;;  %s482_s5 = inlined_call_operand.vmem [shape: f32[1,128], index: 5, kind: input, shape index: {}]   ;;  %s483_s6 = inlined_call_operand.vmem [shape: bf16[128,8], index: 6, kind: input, shape index: {}]   ;;  %s484_s7 = inlined_call_operand.vmem [shape: f32[1,8], index: 7, kind: input, shape index: {}]   ;;  %s485_s1 = inlined_call_operand.vmem [shape: f32[16,8], index: 1, kind: input, shape index: {}]   ;;  %s486_s8 = inlined_call_operand.vmem [shape: f32[16,8], index: 8, kind: output, shape index: {}]  }
   0x1   :  { %v332_v0 = vld [vmem:[%s478_s2 + $0x8] sm:$0xff]  ;;  %v331_v1 = vld [vmem:[%s478_s2] sm:$0xff]  ;;  %v340_v2 = vld [vmem:[%s480_s4 + $0x38] sm:$0xff] }
   0x2   :  { %63 = vmatpush.bf16.msra.mxu0 %v332_v0  ;;  %v30_v3 = vld [vmem:[%s479_s0] sm:$0xff]  ;;  %v31_v4 = vld [vmem:[%s479_s0 + $0x8] sm:$0xff]  ;;  %142 = vmatpush.bf16.msra.mxu1 %v340_v2  ;;  %v339_v5 = vld [vmem:[%s480_s4 + $0x30] sm:$0xff] }
   0x3   :  { %v32_v6 = vpack.c.bf16 %v31_v4, %v30_v3  ;;  %v338_v7 = vld [vmem:[%s480_s4 + $0x28] sm:$0xff]  ;;  %v337_v8 = vld [vmem:[%s480_s4 + $0x20] sm:$0xff]  ;;  %v336_v9 = vld [vmem:[%s480_s4 + $0x18] sm:$0xff] }
   0x4   :  { %v335_v10 = vld [vmem:[%s480_s4 + $0x10] sm:$0xff]  ;;  %v334_v11 = vld [vmem:[%s480_s4 + $0x8] sm:$0xff]  ;;  %v333_v12 = vld [vmem:[%s480_s4] sm:$0xff] }
   0x5   :  { %v348_v13 = vld [vmem:[%s483_s6 + $0x38] sm:$0xff]  ;;  %v347_v14 = vld [vmem:[%s483_s6 + $0x30] sm:$0xff]  ;;  %v346_v15 = vld [vmem:[%s483_s6 + $0x28] sm:$0xff] }
   0x6   :  { %64 = vmatpush.bf16.msra.mxu0 %v331_v1  ;;  %143 = vmatpush.bf16.msra.mxu1 %v339_v5  ;;  %v345_v16 = vld [vmem:[%s483_s6 + $0x20] sm:$0xff]  ;;  %v344_v25 = vld [vmem:[%s483_s6 + $0x18] sm:$0xff]  ;;  %v343_v26 = vld [vmem:[%s483_s6 + $0x10] sm:$0xff] }
   0x7   :  { %227 = vmatpush.bf16.msra.mxu2 %v348_v13  ;;  %v349_v18 = vld [vmem:[%s481_s3] ss:$0 sm:$0xff]  ;;  %v342_v27 = vld [vmem:[%s483_s6 + $0x8] sm:$0xff] }
   0x8   :  { %v341_v28 = vld [vmem:[%s483_s6] sm:$0xff]  ;;  %v242_v42 = vld [vmem:[%s485_s1 + $0x8] sm:$0xff] }
   0x9   :  { %264 = vmatmul.msk.bf16.vlgmr.msra.gmra.mxu0 %vm53_vm0, %v32_v6  ;;  %v350_v30 = vld [vmem:[%s482_s5] ss:$0 sm:$0xff]  ;;  %v330_v45 = vadd.f32 -1.0, %v242_v42 }
   0xa   :  { %144 = vmatpush.bf16.msra.mxu1 %v338_v7  ;;  %v241_v37 = vld [vmem:[%s485_s1] sm:$0xff] }
   0xb   :  { %228 = vmatpush.bf16.msra.mxu2 %v347_v14  ;;  %v329_v38 = vadd.f32 -1.0, %v241_v37  ;;  %v351_v39 = vld [vmem:[%s484_s7] ss:$0 sm:$0xff]  ;;  %v246_v46 = vmul.f32 65536.0, %v330_v45 }
   0xd   :  { %v245_v40 = vmul.f32 65536.0, %v329_v38 }
   0xe   :  { %145 = vmatpush.bf16.msra.mxu1 %v337_v8 }
   0xf   :  { %229 = vmatpush.bf16.msra.mxu2 %v346_v15 }
  0x12   :  { %146 = vmatpush.bf16.msra.mxu1 %v336_v9 }
  0x13   :  { %230 = vmatpush.bf16.msra.mxu2 %v345_v16 }
  0x16   :  { %147 = vmatpush.bf16.msra.mxu1 %v335_v10 }
  0x17   :  { %231 = vmatpush.bf16.msra.mxu2 %v344_v25 }
  0x1a   :  { %148 = vmatpush.bf16.msra.mxu1 %v334_v11 }
  0x1b   :  { %232 = vmatpush.bf16.msra.mxu2 %v343_v26 }
  0x1e   :  { %149 = vmatpush.bf16.msra.mxu1 %v333_v12 }
  0x1f   :  { %233 = vmatpush.bf16.msra.mxu2 %v342_v27 }
  0x23   :  { %234 = vmatpush.bf16.msra.mxu2 %v341_v28 }
  0x86   :  { %v66_v17 = vpop.f32.mrf.mxu0 }
  0x87   :  { %v67_v19 = vadd.f32 %v349_v18, %v66_v17 }
  0x89   :  { %v71_v22 = vmax.f32 %v67_v19, 0.0 }
  0x8e   :  { %v68_v20 = vpop.f32.mrf.mxu0 }
  0x8f   :  { %v69_v21 = vadd.f32 %v349_v18, %v68_v20 }
  0x91   :  { %v72_v23 = vmax.f32 %v69_v21, 0.0 }
  0x93   :  { %v73_v24 = vpack.c.bf16 %v72_v23, %v71_v22 }
  0x95   :  { %150 = vmatmul.bf16.vlgmr.msra.gmra.mxu1 %v73_v24 }
 0x112   :  { %v151_v29 = vpop.f32.mrf.mxu1 }
 0x113   :  { %v152_v31 = vadd.f32 %v350_v30, %v151_v29 }
 0x115   :  { %v156_v34 = vmax.f32 %v152_v31, 0.0 }
 0x11a   :  { %v153_v32 = vpop.f32.mrf.mxu1 }
 0x11b   :  { %v154_v33 = vadd.f32 %v350_v30, %v153_v32 }
 0x11d   :  { %v157_v35 = vmax.f32 %v154_v33, 0.0 }
 0x11f   :  { %v158_v36 = vpack.c.bf16 %v157_v35, %v156_v34 }
 0x121   :  { %235 = vmatmul.bf16.vlgmr.msra.gmra.mxu2 %v158_v36 }
 0x1a4   :  { %v236_v41 = vpop.f32.mrf.mxu2 }
 0x1a5   :  { %v237_v43 = vadd.f32 %v351_v39, %v236_v41 }
 0x1a7   :  { %v247_v44 = vadd.f32 %v245_v40, %v237_v43 }
 0x1a9   :  { %250 = vst.msk [vmem:[%s486_s8] sm:$0xff] %vm249_vm1, %v247_v44 }
 0x1ac   :  { %v238_v47 = vpop.f32.mrf.mxu2 }
 0x1ad   :  { %v239_v48 = vadd.f32 %v351_v39, %v238_v47 }
 0x1af   :  { %v248_v49 = vadd.f32 %v246_v46, %v239_v48 }
 0x1b1   :  { %251 = vst.msk [vmem:[%s486_s8 + $0x8] sm:$0xff] %vm249_vm1, %v248_v49 }

</bundles_post_ra>
